<compile_context>
chip_gen: v7x
topology: tpu7x:2x2x1
jax: 0.10.0
libtpu: 0.0.40
codegen_flags: <defaults>
</compile_context>

<pallas_src>
import jax
import jax.numpy as jnp
from jax.experimental import pallas as pl
from jax.experimental.pallas import tpu as pltpu


def actor_kernel(flag_ref,                      # scalar-prefetch: (1,) int32 in SMEM
                 xT_ref, gumbel_ref, act_in_ref,
                 w1_ref, b1_ref, w2_ref, b2_ref, w3_ref, b3_ref,
                 act_ref, logp_ref, ent_ref):
    """Fused MLP + log-softmax + Gumbel-max sample + log_prob + entropy.

    All activations are in transposed (feature, TB) layout: batch on lanes.
    """
    xT = xT_ref[...]                                                     # (S, TB)

    h1 = jnp.dot(w1_ref[...], xT, preferred_element_type=jnp.float32) + b1_ref[...]
    h1 = jnp.maximum(h1, 0.0)                                            # (16, TB)
    h2 = jnp.dot(w2_ref[...], h1, preferred_element_type=jnp.float32) + b2_ref[...]
    h2 = jnp.maximum(h2, 0.0)                                            # (16, TB)
    logits = (jnp.dot(w3_ref[...], h2, preferred_element_type=jnp.float32)
              + b3_ref[...])                                             # (A, TB)

    # log-softmax over the action axis (sublane axis 0).
    m = jnp.max(logits, axis=0, keepdims=True)                           # (1, TB)
    z = logits - m
    ez = jnp.exp(z)
    se = jnp.sum(ez, axis=0, keepdims=True)                              # (1, TB)
    logp = z - jnp.log(se)                                               # (A, TB)
    probs = ez / se                                                      # (A, TB)

    ent = -jnp.sum(probs * logp, axis=0, keepdims=True)                  # (1, TB)

    # Gumbel-max sampling: argmax over actions of (logits + gumbel), taking
    # the lowest index on ties (matches jnp.argmax / first occurrence).
    pert = logits + gumbel_ref[...]                                      # (A, TB)
    row = jax.lax.broadcasted_iota(jnp.int32, pert.shape, 0)             # (A, TB)
    pmax = jnp.max(pert, axis=0, keepdims=True)                          # (1, TB)
    sampled = jnp.min(jnp.where(pert >= pmax, row, pert.shape[0]),
                      axis=0, keepdims=True).astype(jnp.int32)           # (1, TB)

    use_given = flag_ref[0] != 0
    act = jnp.where(use_given, act_in_ref[...], sampled)                 # (1, TB) i32

    # Per-column gather of log_prob[act] via one-hot select + sublane sum.
    logp_act = jnp.sum(jnp.where(row == act, logp, 0.0),
                       axis=0, keepdims=True)                            # (1, TB)

    act_ref[...] = act
    logp_ref[...] = logp_act.astype(logp_ref.dtype)
    ent_ref[...] = ent.astype(ent_ref.dtype)


def actor_forward(state, params, *, key=None, action=None, gumbel=None, tb=1024):
    """state: (B, state_dim) f32 -> (act (B,) i32, log_prob (B,) f32, entropy (B,) f32)."""
    w1, b1, w2, b2, w3, b3 = params
    B, S = state.shape
    A = w3.shape[0]

    # Lane-dense batch tile: at least 128 lanes, capped so small batches use one step.
    tb = min(tb, max(128, pl.cdiv(B, 128) * 128))
    Bp = pl.cdiv(B, tb) * tb
    grid = (Bp // tb,)

    # Batch on lanes: (S, Bp), zero-pad the tail columns (padded columns produce
    # finite garbage that is sliced away below; no NaNs can be generated).
    xT = jnp.zeros((S, Bp), jnp.float32).at[:, :B].set(state.T.astype(jnp.float32))

    if gumbel is None:
        if key is None:
            key = jax.random.PRNGKey(0)
        gumbel = jax.random.gumbel(key, (A, B), dtype=jnp.float32)
    g = jnp.zeros((A, Bp), jnp.float32).at[:, :B].set(gumbel.astype(jnp.float32))

    if action is None:
        act_in = jnp.zeros((1, Bp), jnp.int32)
        flag = jnp.zeros((1,), jnp.int32)
    else:
        act_in = jnp.zeros((1, Bp), jnp.int32).at[0, :B].set(
            action.reshape(-1).astype(jnp.int32))
        flag = jnp.ones((1,), jnp.int32)

    # Batched (per-grid-step) operands: block over the lane/batch axis.
    def col_spec(rows):
        return pl.BlockSpec((rows, tb), lambda i, flag_ref: (0, i))

    # Weights / biases: whole-array blocks, constant index_map -> VMEM-resident.
    def full_spec(a):
        return pl.BlockSpec(a.shape, lambda i, flag_ref: (0, 0))

    act_out, logp_out, ent_out = pl.pallas_call(
        actor_kernel,
        out_shape=(jax.ShapeDtypeStruct((1, Bp), jnp.int32),
                   jax.ShapeDtypeStruct((1, Bp), jnp.float32),
                   jax.ShapeDtypeStruct((1, Bp), jnp.float32)),
        grid_spec=pltpu.PrefetchScalarGridSpec(
            num_scalar_prefetch=1,
            grid=grid,
            in_specs=[col_spec(S), col_spec(A), col_spec(1),
                      full_spec(w1), full_spec(b1),
                      full_spec(w2), full_spec(b2),
                      full_spec(w3), full_spec(b3)],
            out_specs=[col_spec(1), col_spec(1), col_spec(1)],
        ),
        compiler_params=pltpu.CompilerParams(
            dimension_semantics=("parallel",)),
    )(flag, xT, g, act_in, w1, b1, w2, b2, w3, b3)

    return act_out[0, :B], logp_out[0, :B], ent_out[0, :B]


def init_actor_params(key, state_dim, action_num, hidden=16):
    """nn.Linear-style init; weights kept in PyTorch (out, in) layout, biases (out, 1)."""
    keys = jax.random.split(key, 6)

    def linear(kw, kb, fan_in, fan_out):
        bound = 1.0 / jnp.sqrt(jnp.float32(fan_in))
        w = jax.random.uniform(kw, (fan_out, fan_in), jnp.float32, -bound, bound)
        b = jax.random.uniform(kb, (fan_out, 1), jnp.float32, -bound, bound)
        return w, b

    w1, b1 = linear(keys[0], keys[1], state_dim, hidden)
    w2, b2 = linear(keys[2], keys[3], hidden, hidden)
    w3, b3 = linear(keys[4], keys[5], hidden, action_num)
    return (w1, b1, w2, b2, w3, b3)


def actor_reference(state, params, gumbel, action=None):
    """Plain-JAX reference (same Gumbel-max sampling for bit-comparable checks)."""
    w1, b1, w2, b2, w3, b3 = params
    h = jnp.maximum(state @ w1.T + b1[:, 0], 0.0)
    h = jnp.maximum(h @ w2.T + b2[:, 0], 0.0)
    logits = h @ w3.T + b3[:, 0]
    logp = jax.nn.log_softmax(logits, axis=1)
    ent = -jnp.sum(jnp.exp(logp) * logp, axis=1)
    if action is None:
        act = jnp.argmax(logits + gumbel.T, axis=1).astype(jnp.int32)
    else:
        act = action.reshape(-1).astype(jnp.int32)
    lp = jnp.take_along_axis(logp, act[:, None], axis=1)[:, 0]
    return act, lp, ent


if __name__ == "__main__":
    key = jax.random.PRNGKey(0)
    kp, ks, kg, ka = jax.random.split(key, 4)

    batch, state_dim, action_num = 8, 4, 5
    params = init_actor_params(kp, state_dim, action_num)
    state = jax.random.normal(ks, (batch, state_dim), dtype=jnp.float32)
    gnoise = jax.random.gumbel(kg, (action_num, batch), dtype=jnp.float32)

    # --- sampling path (action=None) ---
    act, logp, ent = actor_forward(state, params, gumbel=gnoise)
    act, logp, ent = jax.block_until_ready((act, logp, ent))
    act_r, logp_r, ent_r = actor_reference(state, params, gnoise)

    assert act.shape == (batch,) and logp.shape == (batch,) and ent.shape == (batch,)
    assert jnp.array_equal(act, act_r), (act, act_r)
    assert jnp.allclose(logp, logp_r, atol=1e-5, rtol=1e-5), (logp, logp_r)
    assert jnp.allclose(ent, ent_r, atol=1e-5, rtol=1e-5), (ent, ent_r)

    # --- provided-action path ---
    given = jax.random.randint(ka, (batch,), 0, action_num, dtype=jnp.int32)
    act2, logp2, ent2 = actor_forward(state, params, gumbel=gnoise, action=given)
    act2, logp2, ent2 = jax.block_until_ready((act2, logp2, ent2))
    act2_r, logp2_r, ent2_r = actor_reference(state, params, gnoise, action=given)

    assert jnp.array_equal(act2, given)
    assert jnp.allclose(logp2, logp2_r, atol=1e-5, rtol=1e-5), (logp2, logp2_r)
    assert jnp.allclose(ent2, ent2_r, atol=1e-5, rtol=1e-5), (ent2, ent2_r)

    print("KERNEL_OK")
</pallas_src>

<mosaic_0001>
module attributes {stable_mosaic.version = 11 : i64} {
  func.func @actor_kernel(%arg0: i32, %arg1: memref<1xi32, #tpu.memory_space<smem>>, %arg2: memref<4x128xf32, #tpu.memory_space<vmem>>, %arg3: memref<5x128xf32, #tpu.memory_space<vmem>>, %arg4: memref<1x128xi32, #tpu.memory_space<vmem>>, %arg5: memref<16x4xf32, #tpu.memory_space<vmem>>, %arg6: memref<16x1xf32, #tpu.memory_space<vmem>>, %arg7: memref<16x16xf32, #tpu.memory_space<vmem>>, %arg8: memref<16x1xf32, #tpu.memory_space<vmem>>, %arg9: memref<5x16xf32, #tpu.memory_space<vmem>>, %arg10: memref<5x1xf32, #tpu.memory_space<vmem>>, %arg11: memref<1x128xi32, #tpu.memory_space<vmem>>, %arg12: memref<1x128xf32, #tpu.memory_space<vmem>>, %arg13: memref<1x128xf32, #tpu.memory_space<vmem>>) attributes {dimension_semantics = [#tpu.dimension_semantics<parallel>], iteration_bounds = array<i64: 1>, scalar_prefetch = 1 : i64, scratch_operands = 0 : i64, tpu.core_type = #tpu.core_type<tc>, window_params = [{transform_indices = @transform_0, window_bounds = array<i64: 4, 128>}, {transform_indices = @transform_1, window_bounds = array<i64: 5, 128>}, {transform_indices = @transform_2, window_bounds = array<i64: 1, 128>}, {pipeline_mode = #tpu.pipeline_mode<synchronous>, transform_indices = @transform_3, window_bounds = array<i64: 16, 4>}, {pipeline_mode = #tpu.pipeline_mode<synchronous>, transform_indices = @transform_4, window_bounds = array<i64: 16, 1>}, {pipeline_mode = #tpu.pipeline_mode<synchronous>, transform_indices = @transform_5, window_bounds = array<i64: 16, 16>}, {pipeline_mode = #tpu.pipeline_mode<synchronous>, transform_indices = @transform_6, window_bounds = array<i64: 16, 1>}, {pipeline_mode = #tpu.pipeline_mode<synchronous>, transform_indices = @transform_7, window_bounds = array<i64: 5, 16>}, {pipeline_mode = #tpu.pipeline_mode<synchronous>, transform_indices = @transform_8, window_bounds = array<i64: 5, 1>}, {transform_indices = @transform_9, window_bounds = array<i64: 1, 128>}, {transform_indices = @transform_10, window_bounds = array<i64: 1, 128>}, {transform_indices = @transform_11, window_bounds = array<i64: 1, 128>}]} {
    %c0 = arith.constant 0 : index
    %c0_0 = arith.constant 0 : index
    %0 = vector.load %arg2[%c0, %c0_0] : memref<4x128xf32, #tpu.memory_space<vmem>>, vector<4x128xf32>
    %c0_1 = arith.constant 0 : index
    %c0_2 = arith.constant 0 : index
    %1 = vector.load %arg5[%c0_1, %c0_2] : memref<16x4xf32, #tpu.memory_space<vmem>>, vector<16x4xf32>
    %cst = arith.constant dense<0.000000e+00> : vector<16x128xf32>
    %2 = tpu.matmul %1, %0, %cst {dimension_numbers = #tpu.dot_dimension_numbers<[1], [0], [0], [1], [0, 0, 1, 1], [], []>} : vector<16x4xf32>, vector<4x128xf32>, vector<16x128xf32> -> vector<16x128xf32>
    %c0_3 = arith.constant 0 : index
    %c0_4 = arith.constant 0 : index
    %3 = vector.load %arg6[%c0_3, %c0_4] : memref<16x1xf32, #tpu.memory_space<vmem>>, vector<16x1xf32>
    %4 = vector.broadcast %3 : vector<16x1xf32> to vector<16x128xf32>
    %5 = arith.addf %2, %4 : vector<16x128xf32>
    %cst_5 = arith.constant 0.000000e+00 : f32
    %6 = vector.broadcast %cst_5 : f32 to vector<16x128xf32>
    %7 = arith.maximumf %5, %6 : vector<16x128xf32>
    %c0_6 = arith.constant 0 : index
    %c0_7 = arith.constant 0 : index
    %8 = vector.load %arg7[%c0_6, %c0_7] : memref<16x16xf32, #tpu.memory_space<vmem>>, vector<16x16xf32>
    %cst_8 = arith.constant dense<0.000000e+00> : vector<16x128xf32>
    %9 = tpu.matmul %8, %7, %cst_8 {dimension_numbers = #tpu.dot_dimension_numbers<[1], [0], [0], [1], [0, 0, 1, 1], [], []>} : vector<16x16xf32>, vector<16x128xf32>, vector<16x128xf32> -> vector<16x128xf32>
    %c0_9 = arith.constant 0 : index
    %c0_10 = arith.constant 0 : index
    %10 = vector.load %arg8[%c0_9, %c0_10] : memref<16x1xf32, #tpu.memory_space<vmem>>, vector<16x1xf32>
    %11 = vector.broadcast %10 : vector<16x1xf32> to vector<16x128xf32>
    %12 = arith.addf %9, %11 : vector<16x128xf32>
    %cst_11 = arith.constant 0.000000e+00 : f32
    %13 = vector.broadcast %cst_11 : f32 to vector<16x128xf32>
    %14 = arith.maximumf %12, %13 : vector<16x128xf32>
    %c0_12 = arith.constant 0 : index
    %c0_13 = arith.constant 0 : index
    %15 = vector.load %arg9[%c0_12, %c0_13] : memref<5x16xf32, #tpu.memory_space<vmem>>, vector<5x16xf32>
    %cst_14 = arith.constant dense<0.000000e+00> : vector<5x128xf32>
    %16 = tpu.matmul %15, %14, %cst_14 {dimension_numbers = #tpu.dot_dimension_numbers<[1], [0], [0], [1], [0, 0, 1, 1], [], []>} : vector<5x16xf32>, vector<16x128xf32>, vector<5x128xf32> -> vector<5x128xf32>
    %c0_15 = arith.constant 0 : index
    %c0_16 = arith.constant 0 : index
    %17 = vector.load %arg10[%c0_15, %c0_16] : memref<5x1xf32, #tpu.memory_space<vmem>>, vector<5x1xf32>
    %18 = vector.broadcast %17 : vector<5x1xf32> to vector<5x128xf32>
    %19 = arith.addf %16, %18 : vector<5x128xf32>
    %cst_17 = arith.constant dense<0xFF800000> : vector<128xf32>
    %20 = vector.multi_reduction <maximumf>, %19, %cst_17 [0] : vector<5x128xf32> to vector<128xf32>
    %21 = vector.shape_cast %20 : vector<128xf32> to vector<1x128xf32>
    %22 = vector.broadcast %21 : vector<1x128xf32> to vector<5x128xf32>
    %23 = arith.subf %19, %22 : vector<5x128xf32>
    %24 = math.exp %23 : vector<5x128xf32>
    %cst_18 = arith.constant dense<0.000000e+00> : vector<128xf32>
    %25 = vector.multi_reduction <add>, %24, %cst_18 [0] : vector<5x128xf32> to vector<128xf32>
    %26 = vector.shape_cast %25 : vector<128xf32> to vector<1x128xf32>
    %27 = math.log %26 : vector<1x128xf32>
    %28 = vector.broadcast %27 : vector<1x128xf32> to vector<5x128xf32>
    %29 = arith.subf %23, %28 : vector<5x128xf32>
    %30 = vector.broadcast %26 : vector<1x128xf32> to vector<5x128xf32>
    %31 = arith.divf %24, %30 : vector<5x128xf32>
    %32 = arith.mulf %31, %29 : vector<5x128xf32>
    %cst_19 = arith.constant dense<0.000000e+00> : vector<128xf32>
    %33 = vector.multi_reduction <add>, %32, %cst_19 [0] : vector<5x128xf32> to vector<128xf32>
    %34 = vector.shape_cast %33 : vector<128xf32> to vector<1x128xf32>
    %cst_20 = arith.constant 0.000000e+00 : f32
    %35 = vector.broadcast %cst_20 : f32 to vector<1x128xf32>
    %36 = arith.subf %35, %34 : vector<1x128xf32>
    %c0_21 = arith.constant 0 : index
    %c0_22 = arith.constant 0 : index
    %37 = vector.load %arg3[%c0_21, %c0_22] : memref<5x128xf32, #tpu.memory_space<vmem>>, vector<5x128xf32>
    %38 = arith.addf %19, %37 : vector<5x128xf32>
    %39 = tpu.iota {dimensions = array<i32: 0>} : vector<5x128xi32>
    %cst_23 = arith.constant dense<0xFF800000> : vector<128xf32>
    %40 = vector.multi_reduction <maximumf>, %38, %cst_23 [0] : vector<5x128xf32> to vector<128xf32>
    %41 = vector.shape_cast %40 : vector<128xf32> to vector<1x128xf32>
    %42 = vector.broadcast %41 : vector<1x128xf32> to vector<5x128xf32>
    %43 = arith.cmpf oge, %38, %42 : vector<5x128xf32>
    %c5_i32 = arith.constant 5 : i32
    %44 = vector.broadcast %c5_i32 : i32 to vector<5x128xi32>
    %45 = arith.select %43, %39, %44 : vector<5x128xi1>, vector<5x128xi32>
    %cst_24 = arith.constant dense<2147483647> : vector<128xi32>
    %46 = vector.multi_reduction <minsi>, %45, %cst_24 [0] : vector<5x128xi32> to vector<128xi32>
    %47 = vector.shape_cast %46 : vector<128xi32> to vector<1x128xi32>
    %c0_25 = arith.constant 0 : index
    %48 = memref.load %arg1[%c0_25] : memref<1xi32, #tpu.memory_space<smem>>
    %c0_i32 = arith.constant 0 : i32
    %49 = arith.cmpi ne, %48, %c0_i32 : i32
    %c0_26 = arith.constant 0 : index
    %c0_27 = arith.constant 0 : index
    %50 = vector.load %arg4[%c0_26, %c0_27] : memref<1x128xi32, #tpu.memory_space<vmem>>, vector<1x128xi32>
    %51 = arith.select %49, %50, %47 : vector<1x128xi32>
    %52 = vector.broadcast %51 : vector<1x128xi32> to vector<5x128xi32>
    %53 = arith.cmpi eq, %39, %52 : vector<5x128xi32>
    %cst_28 = arith.constant 0.000000e+00 : f32
    %54 = vector.broadcast %cst_28 : f32 to vector<5x128xf32>
    %55 = arith.select %53, %29, %54 : vector<5x128xi1>, vector<5x128xf32>
    %cst_29 = arith.constant dense<0.000000e+00> : vector<128xf32>
    %56 = vector.multi_reduction <add>, %55, %cst_29 [0] : vector<5x128xf32> to vector<128xf32>
    %57 = vector.shape_cast %56 : vector<128xf32> to vector<1x128xf32>
    %c0_30 = arith.constant 0 : index
    %c0_31 = arith.constant 0 : index
    %58 = vector.load %arg11[%c0_30, %c0_31] : memref<1x128xi32, #tpu.memory_space<vmem>>, vector<1x128xi32>
    tpu.vector_store %arg11[%c0_30, %c0_31], %51 {strides = array<i32>} : memref<1x128xi32, #tpu.memory_space<vmem>>, vector<1x128xi32>,
    %c0_32 = arith.constant 0 : index
    %c0_33 = arith.constant 0 : index
    %59 = vector.load %arg12[%c0_32, %c0_33] : memref<1x128xf32, #tpu.memory_space<vmem>>, vector<1x128xf32>
    tpu.vector_store %arg12[%c0_32, %c0_33], %57 {strides = array<i32>} : memref<1x128xf32, #tpu.memory_space<vmem>>, vector<1x128xf32>,
    %c0_34 = arith.constant 0 : index
    %c0_35 = arith.constant 0 : index
    %60 = vector.load %arg13[%c0_34, %c0_35] : memref<1x128xf32, #tpu.memory_space<vmem>>, vector<1x128xf32>
    tpu.vector_store %arg13[%c0_34, %c0_35], %36 {strides = array<i32>} : memref<1x128xf32, #tpu.memory_space<vmem>>, vector<1x128xf32>,
    return
  }
  func.func @transform_0(%arg0: i32, %arg1: memref<1xi32, #tpu.memory_space<smem>>) -> (i32, i32) {
    %c0_i32 = arith.constant 0 : i32
    %c0_i32_0 = arith.constant 0 : i32
    return %c0_i32, %arg0 : i32, i32
  }
  func.func @transform_1(%arg0: i32, %arg1: memref<1xi32, #tpu.memory_space<smem>>) -> (i32, i32) {
    %c0_i32 = arith.constant 0 : i32
    %c0_i32_0 = arith.constant 0 : i32
    return %c0_i32, %arg0 : i32, i32
  }
  func.func @transform_2(%arg0: i32, %arg1: memref<1xi32, #tpu.memory_space<smem>>) -> (i32, i32) {
    %c0_i32 = arith.constant 0 : i32
    %c0_i32_0 = arith.constant 0 : i32
    return %c0_i32, %arg0 : i32, i32
  }
  func.func @transform_3(%arg0: i32, %arg1: memref<1xi32, #tpu.memory_space<smem>>) -> (i32, i32) {
    %c0_i32 = arith.constant 0 : i32
    %c0_i32_0 = arith.constant 0 : i32
    %c0_i32_1 = arith.constant 0 : i32
    return %c0_i32, %c0_i32_0 : i32, i32
  }
  func.func @transform_4(%arg0: i32, %arg1: memref<1xi32, #tpu.memory_space<smem>>) -> (i32, i32) {
    %c0_i32 = arith.constant 0 : i32
    %c0_i32_0 = arith.constant 0 : i32
    %c0_i32_1 = arith.constant 0 : i32
    return %c0_i32, %c0_i32_0 : i32, i32
  }
  func.func @transform_5(%arg0: i32, %arg1: memref<1xi32, #tpu.memory_space<smem>>) -> (i32, i32) {
    %c0_i32 = arith.constant 0 : i32
    %c0_i32_0 = arith.constant 0 : i32
    %c0_i32_1 = arith.constant 0 : i32
    return %c0_i32, %c0_i32_0 : i32, i32
  }
  func.func @transform_6(%arg0: i32, %arg1: memref<1xi32, #tpu.memory_space<smem>>) -> (i32, i32) {
    %c0_i32 = arith.constant 0 : i32
    %c0_i32_0 = arith.constant 0 : i32
    %c0_i32_1 = arith.constant 0 : i32
    return %c0_i32, %c0_i32_0 : i32, i32
  }
  func.func @transform_7(%arg0: i32, %arg1: memref<1xi32, #tpu.memory_space<smem>>) -> (i32, i32) {
    %c0_i32 = arith.constant 0 : i32
    %c0_i32_0 = arith.constant 0 : i32
    %c0_i32_1 = arith.constant 0 : i32
    return %c0_i32, %c0_i32_0 : i32, i32
  }
  func.func @transform_8(%arg0: i32, %arg1: memref<1xi32, #tpu.memory_space<smem>>) -> (i32, i32) {
    %c0_i32 = arith.constant 0 : i32
    %c0_i32_0 = arith.constant 0 : i32
    %c0_i32_1 = arith.constant 0 : i32
    return %c0_i32, %c0_i32_0 : i32, i32
  }
  func.func @transform_9(%arg0: i32, %arg1: memref<1xi32, #tpu.memory_space<smem>>) -> (i32, i32) {
    %c0_i32 = arith.constant 0 : i32
    %c0_i32_0 = arith.constant 0 : i32
    return %c0_i32, %arg0 : i32, i32
  }
  func.func @transform_10(%arg0: i32, %arg1: memref<1xi32, #tpu.memory_space<smem>>) -> (i32, i32) {
    %c0_i32 = arith.constant 0 : i32
    %c0_i32_0 = arith.constant 0 : i32
    return %c0_i32, %arg0 : i32, i32
  }
  func.func @transform_11(%arg0: i32, %arg1: memref<1xi32, #tpu.memory_space<smem>>) -> (i32, i32) {
    %c0_i32 = arith.constant 0 : i32
    %c0_i32_0 = arith.constant 0 : i32
    return %c0_i32, %arg0 : i32, i32
  }
}

</mosaic_0001>

<bundles_post_ra>
// kernel: tpu_custom_call.1
= control target key start
LH: loop header
LB: loop body
LE: loop exit
PB: predicated region body
PF: predicated region fallthrough
CT: control target
= control target key end

     0   :  { %19 = vsyncpa [#allocation5], 0  ;;  %vm61_vm0 = vcmask 1043456   ;;  %vm54_vm1 = vcmask 31744   ;;  %v566_v4 = vmov 0   ;;  %s733_s0 = inlined_call_operand.<no memory space> [shape: s32[1], index: 0, kind: input, shape index: {}]   ;;  %s734_s1 = inlined_call_operand.vmem [shape: f32[4,128], index: 1, kind: input, shape index: {}]   ;;  %s735_s2 = inlined_call_operand.vmem [shape: f32[5,128], index: 2, kind: input, shape index: {}]   ;;  %s736_s3 = inlined_call_operand.vmem [shape: s32[1,128], index: 3, kind: input, shape index: {}]   ;;  %s737_s4 = inlined_call_operand.vmem [shape: f32[16,4], index: 4, kind: input, shape index: {}]   ;;  %s738_s5 = inlined_call_operand.vmem [shape: f32[16,1], index: 5, kind: input, shape index: {}]   ;;  %s739_s6 = inlined_call_operand.vmem [shape: f32[16,16], index: 6, kind: input, shape index: {}]   ;;  %s740_s7 = inlined_call_operand.vmem [shape: f32[16,1], index: 7, kind: input, shape index: {}]   ;;  %s741_s8 = inlined_call_operand.vmem [shape: f32[5,16], index: 8, kind: input, shape index: {}]   ;;  %s742_s9 = inlined_call_operand.vmem [shape: f32[5,1], index: 9, kind: input, shape index: {}]   ;;  %s743_s10 = inlined_call_operand.hbm [shape: s32[1,128], index: 10, kind: output, shape index: {0}]   ;;  %s744_s11 = inlined_call_operand.hbm [shape: f32[1,128], index: 11, kind: output, shape index: {1}]   ;;  %s745_s12 = inlined_call_operand.hbm [shape: f32[1,128], index: 12, kind: output, shape index: {2}]  }
   0x1   :  { %v39_v0 = vld [vmem:[%s734_s1] sm:$0xf]  ;;  %v41_v2 = vld [vmem:[%s737_s4 + $0x8] sm:$0xff]  ;;  %488 = vset.pattern.permute.xlu0 %v566_v4 }
   0x2   :  { %v40_v1 = vld [vmem:[%s737_s4] sm:$0xff]  ;;  %455 = vmatprep.subr.msk.mxu0 %vm61_vm0, %v39_v0 }
   0x3   :  { %457 = vmatprep.mubr.msk.f32.mxu0 %vm54_vm1, %v40_v1  ;;  %v42_v3 = vld [vmem:[%s738_s5] sm:$0xff]  ;;  %456 = vmatpush3.msk.msra.mxu0 %vm61_vm0, %v39_v0 }
   0x4   :  { %20 = vsyncpa [#allocation7], 0  ;;  %458 = vmatmul.mubr.msk.f32.vlgmr.msra.gmra.mrb[0].mxu0 %vm54_vm1, %v41_v2  ;;  %46 = vperm.xlu0 %488, %v42_v3   ;;  %v43_v5 = vld [vmem:[%s738_s5 + $0x8] sm:$0xff]  ;;  %v241_v6 = vld [vmem:[%s742_s9] sm:$0x1f]  ;;  %vm156_vm2 = vcmask 130048   ;;  %v354_v47 = vlaneseq }
   0x5   :  { %489 = vset.pattern.permute.xlu1 %v566_v4  ;;  %v142_v7 = vld [vmem:[%s739_s6] sm:$0xff]  ;;  %v145_v9 = vld [vmem:[%s740_s7 + $0x8] sm:$0xff]  ;;  %v567_v20 = vmov 0.0|0.0   ;;  %vm568_vm3 = vmmov 0   ;;  %v569_v21 = vmov 0.0   ;;  %vm320_vm4 = vcmask 1044480  }
   0x6   :  { %464 = vmatprep.mubr.msk.f32.mxu1 %vm156_vm2, %v142_v7  ;;  %v144_v8 = vld [vmem:[%s740_s7] sm:$0xff]  ;;  %v143_v19 = vld [vmem:[%s739_s6 + $0x8] sm:$0xff]  ;;  %478 = vmatprep.subr.bf16.mxu0 %v567_v20  ;;  %v355_v52 = vshrl.u32 %v354_v47, 7  ;;  %p376_p0 = scmp.ne.s32.totalorder %s733_s0, 0  ;;  %s570_s22 = smov [#allocation4]  }
   0x7   :  { %148 = vperm.xlu1 %489, %v144_v8   ;;  %471 = vmatprep.mubr.msk.f32.mxu0 %vm568_vm3, %v569_v21  ;;  %v240_v31 = vld [vmem:[%s741_s8] sm:$0x1f]  ;;  %s404_s23 = sshll.u32 %s570_s22, 4  ;;  %s405_s23 = int_to_ptr.vmem [resolvable:$true] %s404_s23 }
   0x8   :  { %51 = vperm.xlu0 %488, %v43_v5   ;;  %v352_v34 = vld [vmem:[%s735_s2] sm:$0x1f]  ;;  %s378_s21 = scalar_select %p376_p0, 1, 0 }
   0x9   :  { %v377_v1 = vld [vmem:[%s736_s3] sm:$0x1]  ;;  %s496_s0 = scalar_lea.vmem %s405_s23, 16  ;;  %s500_s26 = scalar_lea.vmem %s405_s23, 32 }
   0xa   :  { %v379_v61 = vstv %s378_s21  ;;  %p497_p1 = scmp.ne.s32.totalorder %s405_s23, %s496_s0  ;;  %p501_p2 = scmp.lt.s32.totalorder %s405_s23, %s405_s23 }
   0xb   :  { %153 = vperm.xlu1 %489, %v145_v9   ;;  %vm380_vm8 = vcmp.eq.s32.totalorder %v379_v61, 1  ;;  %p502_p3 = scmp.lt.s32.totalorder %s500_s26, %s496_s0 }
   0xc   :  { %244 = vperm.xlu0 %488, %v241_v6  }
   0xd   :  { %p503_p4 = por %p502_p3, %p501_p2 }
   0xf   :  { %p504_p5 = pnand %p503_p4, %p497_p1 }
  0x83   :  { %v47_v10 = vpop.permute.xlu0 %46 }
  0x86   :  { %v149_v22 = vpop.permute.xlu1 %148 }
  0x87   :  { %v52_v11 = vpop.permute.xlu0 %51 }
  0x8a   :  { %v154_v23 = vpop.permute.xlu1 %153 }
  0x8b   :  { %v245_v32 = vpop.permute.xlu0 %244 }
  0xd7   :  { %v459_v12 = vpop.f32.mrb[0].mxu0 }
  0xd8   :  { %v137_v13 = vadd.f32 %v459_v12, %v52_v11  ;;  %v131_v14 = vpop.f32.mrb[1].mxu0 }
  0xd9   :  { %v132_v15 = vadd.f32 %v131_v14, %v47_v10 }
  0xda   :  { %v141_v16 = vmax.f32 %v137_v13, 0.0 }
  0xdb   :  { %v140_v17 = vmax.f32 %v132_v15, 0.0 }
  0xdd   :  { %v474_v18 = vpack.c.bf16 %v141_v16, %v140_v17 }
  0xdf   :  { %475 = vmatprep.subr.bf16.mxu1 %v474_v18 }
  0xe0   :  { %477 = vmatpush3.bf16.msra.mxu1 %v474_v18 }
  0xe3   :  { %465 = vmatmul.mubr.msk.f32.vlgmr.msra.gmra.mrb[0].mxu1 %vm156_vm2, %v143_v19 }
 0x1b6   :  { %v466_v24 = vpop.f32.mrb[0].mxu1 }
 0x1b7   :  { %v235_v25 = vadd.f32 %v466_v24, %v154_v23  ;;  %v229_v26 = vpop.f32.mrb[1].mxu1 }
 0x1b8   :  { %v230_v27 = vadd.f32 %v229_v26, %v149_v22 }
 0x1b9   :  { %v239_v28 = vmax.f32 %v235_v25, 0.0 }
 0x1ba   :  { %v238_v29 = vmax.f32 %v230_v27, 0.0 }
 0x1bc   :  { %v479_v30 = vpack.c.bf16 %v239_v28, %v238_v29 }
 0x1be   :  { %480 = vmatpush3.bf16.msra.mxu0 %v479_v30 }
 0x1c1   :  { %472 = vmatmul.mubr.msk.f32.vlgmr.msra.gmra.mrb[2].mxu0 %vm156_vm2, %v240_v31 }
 0x294   :  { %v316_v33 = vpop.f32.mrb[2].mxu0 }
 0x295   :  { %v317_v35 = vadd.f32 %v316_v33, %v245_v32  ;;  %v473_v36 = vpop.f32.mrb[3].mxu0 }
 0x297   :  { %v321_v37 = vsel %vm320_vm4, %v317_v35, -inf  ;;  %v353_v38 = vadd.f32 %v352_v34, %v317_v35 }
 0x298   :  { %v322_v39 = vrot.slane %v321_v37, 4 }
 0x299   :  { %v356_v40 = vsel %vm320_vm4, %v353_v38, -inf }
 0x29a   :  { %v323_v41 = vmax.f32 %v321_v37, %v322_v39  ;;  %v357_v42 = vrot.slane %v356_v40, 4 }
 0x29c   :  { %v324_v43 = vrot.slane %v323_v41, 2  ;;  %v358_v44 = vmax.f32 %v356_v40, %v357_v42 }
 0x29e   :  { %v325_v45 = vmax.f32 %v323_v41, %v324_v43  ;;  %v359_v46 = vrot.slane %v358_v44, 2 }
 0x2a0   :  { %v326_v48 = vrot.slane %v325_v45, 1  ;;  %v360_v49 = vmax.f32 %v358_v44, %v359_v46 }
 0x2a2   :  { %v327_v50 = vmax.f32 %v325_v45, %v326_v48  ;;  %v361_v51 = vrot.slane %v360_v49, 1 }
 0x2a4   :  { %v328_v53 = vsub.f32 %v317_v35, %v327_v50  ;;  %v362_v54 = vmax.f32 %v360_v49, %v361_v51 }
 0x2a6   :  { %v329_v55 = vmul.f32 1.442695, %v328_v53  ;;  %vm363_vm5 = vcmp.ge.f32.partialorder %v353_v38, %v362_v54 }
 0x2a7   :  { %v364_v56 = vsel %vm363_vm5, %v355_v52, 5 }
 0x2a8   :  { %490 = vpow2.f32 %v329_v55  ;;  %v365_v57 = vsel %vm320_vm4, %v364_v56, 2147483647 }
 0x2a9   :  { %v366_v58 = vrot.slane %v365_v57, 4 }
 0x2ab   :  { %vm367_vm6 = vcmp.lt.s32.totalorder %v365_v57, %v366_v58 }
 0x2ac   :  { %v368_v59 = vsel %vm367_vm6, %v365_v57, %v366_v58 }
 0x2ad   :  { %v369_v60 = vrot.slane %v368_v59, 2 }
 0x2af   :  { %vm370_vm7 = vcmp.lt.s32.totalorder %v368_v59, %v369_v60 }
 0x2b0   :  { %v371_v62 = vsel %vm370_vm7, %v368_v59, %v369_v60 }
 0x2b1   :  { %v372_v63 = vrot.slane %v371_v62, 1 }
 0x2b2   :  { %v491_v0 = vpop.eup %490 }
 0x2b3   :  { %v331_v2 = vsel %vm320_vm4, %v491_v0, 0.0  ;;  %vm373_vm9 = vcmp.lt.s32.totalorder %v371_v62, %v372_v63 }
 0x2b4   :  { %v332_v3 = vrot.slane %v331_v2, 4  ;;  %v374_v4 = vsel %vm373_vm9, %v371_v62, %v372_v63 }
 0x2b5   :  { %v381_v5 = vsel %vm380_vm8, %v377_v1, %v374_v4 }
 0x2b6   :  { %v333_v6 = vadd.f32 %v332_v3, %v331_v2  ;;  %395 = vst [vmem:[#allocation4] sm:$0x1] %v381_v5 }
 0x2b7   :  { %507 = shalt.err (!%p504_p5)
}
 0x2b8   :  { %s508_s28 = scalar_lea.hbm %s743_s10, 16 }
 0x2b9   :  { %p509_p6 = scmp.ne.s32.totalorder %s743_s10, %s508_s28  ;;  %p512_p7 = scmp.lt.u32.totalorder %s508_s28, %s743_s10 }
 0x2bb   :  { %p514_p8 = pnand %p512_p7, %p509_p6 }
 0x2bd   :  { %517 = shalt.err (!%p514_p8)
}
 0x2be   :  { %407 = dma.vmem_to_hbm [thread:$0]  %s405_s23, 16, %s743_s10, [#allocation5]   ;;  %v334_v7 = vrot.slane %v333_v6, 2  ;;  %v384_v11 = vsub.s32 0, %v355_v52 }
 0x2bf   :  { %s571_s10 = smov [#allocation6]   ;;  %s572_s16 = smov [#allocation8]  }
 0x2c0   :  { %v335_v8 = vadd.f32 %v334_v7, %v333_v6  ;;  %v385_v13 = vrot.slane %v381_v5, %v384_v11  ;;  %s414_s15 = sshll.u32 %s571_s10, 4  ;;  %s424_s5 = sshll.u32 %s572_s16, 4  ;;  %s415_s15 = int_to_ptr.vmem [resolvable:$true] %s414_s15  ;;  %s701_s5 = int_to_ptr.vmem [resolvable:$true] %s424_s5 }
 0x2c1   :  { %s518_s17 = scalar_lea.vmem %s415_s15, 16  ;;  %s522_s9 = scalar_lea.vmem %s415_s15, 32 }
 0x2c2   :  { %v336_v9 = vrot.slane %v335_v8, 1  ;;  %vm386_vm10 = vcmp.eq.s32.totalorder %v355_v52, %v385_v13  ;;  %p519_p9 = scmp.ne.s32.totalorder %s415_s15, %s518_s17  ;;  %p523_p10 = scmp.lt.s32.totalorder %s415_s15, %s415_s15 }
 0x2c3   :  { %p524_p11 = scmp.lt.s32.totalorder %s522_s9, %s518_s17 }
 0x2c4   :  { %v337_v10 = vadd.f32 %v336_v9, %v335_v8 }
 0x2c5   :  { %p525_p12 = por %p524_p11, %p523_p10 }
 0x2c6   :  { %492 = vlog2.f32 %v337_v10 }
 0x2c7   :  { %494 = vrcp.f32 %v337_v10  ;;  %p526_p13 = pnand %p525_p12, %p519_p9 }
 0x2d0   :  { %v493_v12 = vpop.eup %492 }
 0x2d1   :  { %v495_v14 = vpop.eup %494  ;;  %v339_v15 = vmul.f32 0.6931472, %v493_v12 }
 0x2d2   :  { %v342_v17 = vmul.f32 %v495_v14, %v491_v0 }
 0x2d3   :  { %v340_v16 = vsub.f32 %v328_v53, %v339_v15 }
 0x2d5   :  { %v343_v18 = vmul.f32 %v342_v17, %v340_v16  ;;  %v387_v19 = vsel %vm386_vm10, %v340_v16, 0.0 }
 0x2d6   :  { %v388_v20 = vsel %vm320_vm4, %v387_v19, 0.0 }
 0x2d7   :  { %v389_v21 = vrot.slane %v388_v20, 4  ;;  %v344_v22 = vsel %vm320_vm4, %v343_v18, 0.0 }
 0x2d8   :  { %v345_v23 = vrot.slane %v344_v22, 4 }
 0x2d9   :  { %v390_v24 = vadd.f32 %v389_v21, %v388_v20 }
 0x2da   :  { %v346_v25 = vadd.f32 %v345_v23, %v344_v22 }
 0x2db   :  { %v391_v26 = vrot.slane %v390_v24, 2 }
 0x2dc   :  { %v347_v27 = vrot.slane %v346_v25, 2 }
 0x2dd   :  { %v392_v28 = vadd.f32 %v391_v26, %v390_v24 }
 0x2de   :  { %v348_v29 = vadd.f32 %v347_v27, %v346_v25 }
 0x2df   :  { %v393_v30 = vrot.slane %v392_v28, 1 }
 0x2e0   :  { %v349_v31 = vrot.slane %v348_v29, 1 }
 0x2e1   :  { %v394_v32 = vadd.f32 %v393_v30, %v392_v28 }
 0x2e2   :  { %v350_v33 = vadd.f32 %v349_v31, %v348_v29 }
 0x2e3   :  { %396 = vst [vmem:[#allocation6] sm:$0x1] %v394_v32 }
 0x2e4   :  { %529 = shalt.err (!%p526_p13)
}
 0x2e5   :  { %s530_s19 = scalar_lea.hbm %s744_s11, 16 }
 0x2e6   :  { %p531_p0 = scmp.ne.s32.totalorder %s744_s11, %s530_s19  ;;  %p534_p1 = scmp.lt.u32.totalorder %s530_s19, %s744_s11 }
 0x2e8   :  { %p536_p2 = pnand %p534_p1, %p531_p0 }
 0x2ea   :  { %539 = shalt.err (!%p536_p2)
}
 0x2eb   :  { %417 = dma.vmem_to_hbm [thread:$0]  %s415_s15, 16, %s744_s11, [#allocation7]   ;;  %v351_v34 = vsub.f32 0.0, %v350_v33 }
 0x2ec   :  { %s540_s23 = scalar_lea.vmem %s701_s5, 16  ;;  %s544_s24 = scalar_lea.vmem %s701_s5, 32 }
 0x2ed   :  { %397 = vst [vmem:[#allocation8] sm:$0x1] %v351_v34  ;;  %p541_p3 = scmp.ne.s32.totalorder %s701_s5, %s540_s23  ;;  %p545_p4 = scmp.lt.s32.totalorder %s701_s5, %s701_s5 }
 0x2ee   :  { %p546_p5 = scmp.lt.s32.totalorder %s544_s24, %s540_s23 }
 0x2f0   :  { %p547_p6 = por %p546_p5, %p545_p4 }
 0x2f2   :  { %p548_p7 = pnand %p547_p6, %p541_p3 }
 0x2f4   :  { %551 = shalt.err (!%p548_p7)
}
 0x2f5   :  { %s552_s26 = scalar_lea.hbm %s745_s12, 16 }
 0x2f6   :  { %p553_p8 = scmp.ne.s32.totalorder %s745_s12, %s552_s26  ;;  %p556_p9 = scmp.lt.u32.totalorder %s552_s26, %s745_s12 }
 0x2f8   :  { %p558_p10 = pnand %p556_p9, %p553_p8 }
 0x2fa   :  { %561 = shalt.err (!%p558_p10)
}
 0x2fb   :  { %427 = dma.vmem_to_hbm [thread:$0]  %s701_s5, 16, %s745_s12, [#allocation7]  }
 0x2fc   :  { %562 = dma.done.wait [#allocation5], 16  }
 0x2fd   :  { %563 = vsyncadd [#allocation5], 4294967280 }
 0x2fe   :  { %564 = dma.done.wait [#allocation7], 32  }
 0x2ff   :  { %565 = vsyncadd [#allocation7], 4294967264 }
 0x300   :  { %437 = vsyncpa [#allocation5], 1 }
 0x301   :  { %438 = vsyncpa [#allocation7], 1 }

</bundles_post_ra>
